<compile_context>
chip_gen: v7x
topology: tpu7x:2x2x1
jax: 0.10.0
libtpu: 0.0.40
codegen_flags: <defaults>
</compile_context>

<pallas_src>
import functools

import jax
import jax.numpy as jnp
from jax import lax
from jax.experimental import pallas as pl
from jax.experimental.pallas import tpu as pltpu


def _round_up(x, m):
    return ((x + m - 1) // m) * m


def _opl_tile_kernel(rid_ref, cid_ref, fr_ref, fc_ref, labr_ref, labc_ref,
                     out_ref, acc_ref):
    """One (row-block, col-block) Gram tile: K-accumulate, reduce on last k."""
    t = pl.program_id(0)
    k = pl.program_id(1)
    nk = pl.num_programs(1)

    @pl.when(k == 0)
    def _():
        acc_ref[...] = jnp.zeros_like(acc_ref)

    # A @ B.T contraction on the feature (last) dims -- MXU-native, no in-kernel
    # transpose; operands stay in their stored dtype (all casting is wrapper-side).
    acc_ref[...] += lax.dot_general(
        fr_ref[...], fc_ref[...],
        dimension_numbers=(((1,), (1,)), ((), ())),
        preferred_element_type=jnp.float32)

    @pl.when(k == nk - 1)
    def _():
        i = rid_ref[t]
        j = cid_ref[t]
        is_diag = i == j

        dot = acc_ref[...]                                        # (TB, TB) f32
        abs_dot = jnp.abs(dot)
        same_f = (labr_ref[...] == labc_ref[...]).astype(jnp.float32)

        s_same = jnp.sum(dot * same_f)          # sum dot over same-label pairs
        c_same = jnp.sum(same_f)                # count of same-label pairs
        s_abs = jnp.sum(abs_dot)                # sum |dot| over all pairs
        s_abs_same = jnp.sum(abs_dot * same_f)  # sum |dot| over same-label pairs

        # Off-diagonal tiles stand in for their mirror image (Gram symmetry).
        w = jnp.where(is_diag, 1.0, 2.0)

        # Pack the partials into one lane-dense (8,128) vreg (sublane k = partial k).
        sub = lax.broadcasted_iota(jnp.int32, (8, 128), 0)
        part = w * (jnp.where(sub == 0, s_same, 0.0)
                    + jnp.where(sub == 1, c_same, 0.0)
                    + jnp.where(sub == 2, s_abs, 0.0)
                    + jnp.where(sub == 3, s_abs_same, 0.0))
        out_ref[...] = part[None]

        # The trace only exists on diagonal tiles; gate the iota/diag work there.
        @pl.when(is_diag)
        def _():
            tb = dot.shape[0]
            rl = lax.broadcasted_iota(jnp.int32, (tb, tb), 0)
            cl = lax.broadcasted_iota(jnp.int32, (tb, tb), 1)
            tr = jnp.sum(jnp.where(rl == cl, dot, 0.0))
            out_ref[...] += jnp.where(sub == 4, tr, 0.0)[None]


@functools.partial(jax.jit, static_argnames=("block_rows", "block_feat", "gram_dtype"))
def orthogonal_projection_loss(features, labels, *, block_rows=None,
                               block_feat=None, gram_dtype=None):
    """features: (B, D) float, labels: (B,) int. Returns (loss, pos_mean, neg_mean)."""
    B, D = features.shape

    # Row-tile size: 256 feeds v6e/v7x 256x256 MXUs (decomposes onto v5e's 128^2);
    # 128 for small batches to limit padding.  Sweep block_rows=512 on v6e.
    TB = block_rows if block_rows is not None else (256 if B > 128 else 128)
    TB = _round_up(TB, 128)
    Bp = _round_up(B, TB)
    num_i = Bp // TB

    # Feature-dim (K) tile: single chunk for D <= 1024, else 512-wide chunks so
    # VMEM stays bounded independently of D (v7x's 64 MiB part).
    if block_feat is not None:
        TK = _round_up(block_feat, 128)
    else:
        d128 = _round_up(max(D, 1), 128)
        TK = d128 if d128 <= 1024 else 512
    Dp = _round_up(max(D, 1), TK)
    num_k = Dp // TK

    # bf16 inputs stay bf16 on the MXU (f32 accumulation). gram_dtype=jnp.bfloat16
    # is an opt-in lower-precision Gram for f32 inputs (useful on v5e).
    if gram_dtype is not None:
        mm_dtype = jnp.dtype(gram_dtype)
    else:
        mm_dtype = jnp.bfloat16 if features.dtype == jnp.bfloat16 else jnp.float32

    # L2-normalize ONCE here (matches F.normalize(p=2, dim=1, eps=1e-12)), then
    # zero-pad: padded rows / feature columns contribute exactly 0 to every dot.
    f32 = features.astype(jnp.float32)
    norm = jnp.sqrt(jnp.sum(f32 * f32, axis=1, keepdims=True))
    f_norm = f32 / jnp.maximum(norm, 1e-12)
    f_mm = jnp.pad(f_norm, ((0, Bp - B), (0, Dp - D))).astype(mm_dtype)

    # Padded rows get mutually-distinct sentinel labels strictly below every real
    # label, so the only spurious "same-label" pairs are their Bp-B diagonal
    # self-pairs (with zero dot), removed analytically below.
    pad_n = Bp - B
    lab = labels.astype(jnp.int32).reshape(B)
    sentinels = jnp.min(lab) - 1 - jnp.arange(pad_n, dtype=jnp.int32)
    lab_p = jnp.concatenate([lab, sentinels])
    lab_row = lab_p.reshape(Bp, 1)
    lab_col = lab_p.reshape(1, Bp)

    # Flattened upper-triangular (j >= i) tile grid: ~2x fewer MXU flops and
    # column-stream HBM reads than a full grid.  Each grid step does identical
    # work, so the "parallel" t axis splits evenly across TensorCores.
    tri = [(i, j) for i in range(num_i) for j in range(i, num_i)]
    num_t = len(tri)
    rid = jnp.asarray([p[0] for p in tri], dtype=jnp.int32)
    cid = jnp.asarray([p[1] for p in tri], dtype=jnp.int32)

    # VMEM budget from the real operand itemsize (+ headroom), capped for v7x.
    itemsize = jnp.dtype(mm_dtype).itemsize
    vmem_need = (2 * 2 * TB * TK * itemsize    # row + col feature tiles, double-buffered
                 + 2 * 2 * TB * 128 * 4        # lane-padded label tiles
                 + TB * TB * 4                 # f32 Gram accumulator scratch
                 + 2 * 8 * 128 * 4)            # output partials block
    vmem_limit = int(min(vmem_need + (8 << 20), 64 << 20))

    cost = pl.CostEstimate(
        flops=2 * num_t * TB * TB * Dp + 8 * num_t * TB * TB,
        transcendentals=0,
        bytes_accessed=(num_t * num_k * 2 * TB * TK * itemsize   # feature tiles
                        + num_t * 2 * TB * 4                     # label tiles
                        + num_t * 8 * 128 * 4),                  # partials
    )

    grid_spec = pltpu.PrefetchScalarGridSpec(
        num_scalar_prefetch=2,
        grid=(num_t, num_k),
        in_specs=[
            pl.BlockSpec((TB, TK), lambda t, k, rt, ct: (rt[t], k)),   # row feature tile
            pl.BlockSpec((TB, TK), lambda t, k, rt, ct: (ct[t], k)),   # col feature tile
            pl.BlockSpec((TB, 1), lambda t, k, rt, ct: (rt[t], 0)),    # row labels
            pl.BlockSpec((1, TB), lambda t, k, rt, ct: (0, ct[t])),    # col labels
        ],
        out_specs=pl.BlockSpec((1, 8, 128), lambda t, k, rt, ct: (t, 0, 0)),
        scratch_shapes=[pltpu.VMEM((TB, TB), jnp.float32)],
    )

    partials = pl.pallas_call(
        _opl_tile_kernel,
        grid_spec=grid_spec,
        out_shape=jax.ShapeDtypeStruct((num_t, 8, 128), jnp.float32),
        compiler_params=pltpu.CompilerParams(
            dimension_semantics=("parallel", "arbitrary"),
            vmem_limit_bytes=vmem_limit,
        ),
        cost_estimate=cost,
    )(rid, cid, f_mm, f_mm, lab_row, lab_col)

    # Tiny, cross-core-safe final combine in plain JAX.
    totals = jnp.sum(partials[:, :, 0], axis=0)                   # (8,)
    s_same, c_same, s_abs, s_abs_same, tr = (totals[0], totals[1], totals[2],
                                             totals[3], totals[4])
    bf = jnp.float32(B)
    c_same = c_same - jnp.float32(pad_n)        # drop padded diagonal self-pairs
    pos_mean = (s_same - tr) / ((c_same - bf) + 1e-6)             # excludes diagonal
    neg_mean = (s_abs - s_abs_same) / ((bf * bf - c_same) + 1e-6)
    loss = 1.0 - pos_mean + 0.7 * neg_mean
    return loss, pos_mean, neg_mean


def _reference(features, labels):
    f = features.astype(jnp.float32)
    f = f / jnp.maximum(jnp.linalg.norm(f, axis=1, keepdims=True), 1e-12)
    dot = f @ f.T
    lab = labels[:, None]
    mask = lab == lab.T
    eye = jnp.eye(mask.shape[0], dtype=bool)
    mask_pos = jnp.where(mask & (~eye), 1.0, 0.0)
    mask_neg = jnp.where(mask, 0.0, 1.0)
    pos_mean = jnp.sum(mask_pos * dot) / (jnp.sum(mask_pos) + 1e-6)
    neg_mean = jnp.sum(jnp.abs(mask_neg * dot)) / (jnp.sum(mask_neg) + 1e-6)
    return 1.0 - pos_mean + 0.7 * neg_mean, pos_mean, neg_mean


if __name__ == "__main__":
    key = jax.random.PRNGKey(0)
    kf, kl = jax.random.split(key)

    # Small demo shape consistent with the module: batch=8 samples, 32-dim features.
    B, D = 8, 32
    features = jax.random.normal(kf, (B, D), dtype=jnp.float32)
    labels = jax.random.randint(kl, (B,), 0, 4, dtype=jnp.int32)

    loss, pos_mean, neg_mean = orthogonal_projection_loss(features, labels)
    jax.block_until_ready((loss, pos_mean, neg_mean))

    ref_loss, ref_pos, ref_neg = _reference(features, labels)
    assert jnp.allclose(loss, ref_loss, atol=1e-5), (loss, ref_loss)
    assert jnp.allclose(pos_mean, ref_pos, atol=1e-5), (pos_mean, ref_pos)
    assert jnp.allclose(neg_mean, ref_neg, atol=1e-5), (neg_mean, ref_neg)

    # Second check: non-multiple shapes with small tiles -> exercises row padding,
    # sentinel labels, the flattened triangular (j>=i) grid (num_i=2 -> 3 tiles),
    # and the K-tiled accumulation path (num_k=3).
    kf2, kl2 = jax.random.split(jax.random.PRNGKey(1))
    B2, D2 = 200, 300
    f2 = jax.random.normal(kf2, (B2, D2), dtype=jnp.float32)
    l2 = jax.random.randint(kl2, (B2,), 0, 5, dtype=jnp.int32)
    got2 = orthogonal_projection_loss(f2, l2, block_rows=128, block_feat=128)
    jax.block_until_ready(got2)
    ref2 = _reference(f2, l2)
    for got, want in zip(got2, ref2):
        assert jnp.allclose(got, want, atol=1e-4, rtol=1e-5), (got, want)

    print("KERNEL_OK")
</pallas_src>

<mosaic_0001>
module attributes {stable_mosaic.version = 11 : i64} {
  func.func @_opl_tile_kernel(%arg0: i32, %arg1: i32, %arg2: memref<1xi32, #tpu.memory_space<smem>>, %arg3: memref<1xi32, #tpu.memory_space<smem>>, %arg4: memref<128x128xf32, #tpu.memory_space<vmem>>, %arg5: memref<128x128xf32, #tpu.memory_space<vmem>>, %arg6: memref<128x1xi32, #tpu.memory_space<vmem>>, %arg7: memref<1x128xi32, #tpu.memory_space<vmem>>, %arg8: memref<1x8x128xf32, #tpu.memory_space<vmem>>, %arg9: memref<128x128xf32, #tpu.memory_space<vmem>>) attributes {dimension_semantics = [#tpu.dimension_semantics<parallel>, #tpu.dimension_semantics<arbitrary>], iteration_bounds = array<i64: 1, 1>, scalar_prefetch = 2 : i64, scratch_operands = 1 : i64, tpu.core_type = #tpu.core_type<tc>, window_params = [{transform_indices = @transform_0, window_bounds = array<i64: 128, 128>}, {transform_indices = @transform_1, window_bounds = array<i64: 128, 128>}, {transform_indices = @transform_2, window_bounds = array<i64: 128, 1>}, {transform_indices = @transform_3, window_bounds = array<i64: 1, 128>}, {transform_indices = @transform_4, window_bounds = array<i64: 1, 8, 128>}]} {
    %c0_i32 = arith.constant 0 : i32
    %0 = arith.cmpi eq, %arg1, %c0_i32 : i32
    %1 = arith.extui %0 : i1 to i32
    %c0_i32_0 = arith.constant 0 : i32
    %2 = arith.cmpi ne, %1, %c0_i32_0 : i32
    scf.if %2 {
      %cst_10 = arith.constant 0.000000e+00 : f32
      %12 = vector.broadcast %cst_10 : f32 to vector<128x128xf32>
      %c0_11 = arith.constant 0 : index
      %c0_12 = arith.constant 0 : index
      %13 = vector.load %arg9[%c0_11, %c0_12] : memref<128x128xf32, #tpu.memory_space<vmem>>, vector<128x128xf32>
      tpu.vector_store %arg9[%c0_11, %c0_12], %12 {strides = array<i32>} : memref<128x128xf32, #tpu.memory_space<vmem>>, vector<128x128xf32>,
    } else {
    }
    %c0 = arith.constant 0 : index
    %c0_1 = arith.constant 0 : index
    %3 = vector.load %arg9[%c0, %c0_1] : memref<128x128xf32, #tpu.memory_space<vmem>>, vector<128x128xf32>
    %c0_2 = arith.constant 0 : index
    %c0_3 = arith.constant 0 : index
    %4 = vector.load %arg4[%c0_2, %c0_3] : memref<128x128xf32, #tpu.memory_space<vmem>>, vector<128x128xf32>
    %c0_4 = arith.constant 0 : index
    %c0_5 = arith.constant 0 : index
    %5 = vector.load %arg5[%c0_4, %c0_5] : memref<128x128xf32, #tpu.memory_space<vmem>>, vector<128x128xf32>
    %cst = arith.constant dense<0.000000e+00> : vector<128x128xf32>
    %6 = tpu.matmul %4, %5, %cst {dimension_numbers = #tpu.dot_dimension_numbers<[1], [1], [0], [0], [0, 0, 1, 0], [], []>} : vector<128x128xf32>, vector<128x128xf32>, vector<128x128xf32> -> vector<128x128xf32>
    %7 = arith.addf %3, %6 : vector<128x128xf32>
    %c0_6 = arith.constant 0 : index
    %c0_7 = arith.constant 0 : index
    %8 = vector.load %arg9[%c0_6, %c0_7] : memref<128x128xf32, #tpu.memory_space<vmem>>, vector<128x128xf32>
    tpu.vector_store %arg9[%c0_6, %c0_7], %7 {strides = array<i32>} : memref<128x128xf32, #tpu.memory_space<vmem>>, vector<128x128xf32>,
    %c0_i32_8 = arith.constant 0 : i32
    %9 = arith.cmpi eq, %arg1, %c0_i32_8 : i32
    %10 = arith.extui %9 : i1 to i32
    %c0_i32_9 = arith.constant 0 : i32
    %11 = arith.cmpi ne, %10, %c0_i32_9 : i32
    scf.if %11 {
      %12 = arith.index_cast %arg0 : i32 to index
      %13 = memref.load %arg2[%12] : memref<1xi32, #tpu.memory_space<smem>>
      %14 = arith.index_cast %arg0 : i32 to index
      %15 = memref.load %arg3[%14] : memref<1xi32, #tpu.memory_space<smem>>
      %16 = arith.cmpi eq, %13, %15 : i32
      %c0_10 = arith.constant 0 : index
      %c0_11 = arith.constant 0 : index
      %17 = vector.load %arg9[%c0_10, %c0_11] : memref<128x128xf32, #tpu.memory_space<vmem>>, vector<128x128xf32>
      %18 = math.absf %17 : vector<128x128xf32>
      %c0_12 = arith.constant 0 : index
      %c0_13 = arith.constant 0 : index
      %19 = vector.load %arg6[%c0_12, %c0_13] : memref<128x1xi32, #tpu.memory_space<vmem>>, vector<128x1xi32>
      %c0_14 = arith.constant 0 : index
      %c0_15 = arith.constant 0 : index
      %20 = vector.load %arg7[%c0_14, %c0_15] : memref<1x128xi32, #tpu.memory_space<vmem>>, vector<1x128xi32>
      %21 = vector.broadcast %19 : vector<128x1xi32> to vector<128x128xi32>
      %22 = vector.broadcast %20 : vector<1x128xi32> to vector<128x128xi32>
      %23 = arith.cmpi eq, %21, %22 : vector<128x128xi32>
      %24 = arith.extui %23 : vector<128x128xi1> to vector<128x128xi32>
      %25 = arith.sitofp %24 : vector<128x128xi32> to vector<128x128xf32>
      %26 = arith.mulf %17, %25 : vector<128x128xf32>
      %27 = vector.shape_cast %26 : vector<128x128xf32> to vector<1x128x128xf32>
      %cst_16 = arith.constant dense<0.000000e+00> : vector<1xf32>
      %28 = vector.multi_reduction <add>, %27, %cst_16 [1, 2] : vector<1x128x128xf32> to vector<1xf32>
      %29 = vector.shape_cast %28 : vector<1xf32> to vector<1x1x1xf32>
      %30 = vector.extract %29[0, 0, 0] : f32 from vector<1x1x1xf32>
      %31 = vector.shape_cast %25 : vector<128x128xf32> to vector<1x128x128xf32>
      %cst_17 = arith.constant dense<0.000000e+00> : vector<1xf32>
      %32 = vector.multi_reduction <add>, %31, %cst_17 [1, 2] : vector<1x128x128xf32> to vector<1xf32>
      %33 = vector.shape_cast %32 : vector<1xf32> to vector<1x1x1xf32>
      %34 = vector.extract %33[0, 0, 0] : f32 from vector<1x1x1xf32>
      %35 = vector.shape_cast %18 : vector<128x128xf32> to vector<1x128x128xf32>
      %cst_18 = arith.constant dense<0.000000e+00> : vector<1xf32>
      %36 = vector.multi_reduction <add>, %35, %cst_18 [1, 2] : vector<1x128x128xf32> to vector<1xf32>
      %37 = vector.shape_cast %36 : vector<1xf32> to vector<1x1x1xf32>
      %38 = vector.extract %37[0, 0, 0] : f32 from vector<1x1x1xf32>
      %39 = arith.mulf %18, %25 : vector<128x128xf32>
      %40 = vector.shape_cast %39 : vector<128x128xf32> to vector<1x128x128xf32>
      %cst_19 = arith.constant dense<0.000000e+00> : vector<1xf32>
      %41 = vector.multi_reduction <add>, %40, %cst_19 [1, 2] : vector<1x128x128xf32> to vector<1xf32>
      %42 = vector.shape_cast %41 : vector<1xf32> to vector<1x1x1xf32>
      %43 = vector.extract %42[0, 0, 0] : f32 from vector<1x1x1xf32>
      %cst_20 = arith.constant 1.000000e+00 : f32
      %cst_21 = arith.constant 2.000000e+00 : f32
      %44 = arith.select %16, %cst_20, %cst_21 : f32
      %45 = tpu.iota {dimensions = array<i32: 0>} : vector<8x128xi32>
      %c0_i32_22 = arith.constant 0 : i32
      %46 = vector.broadcast %c0_i32_22 : i32 to vector<8x128xi32>
      %47 = arith.cmpi eq, %45, %46 : vector<8x128xi32>
      %cst_23 = arith.constant 0.000000e+00 : f32
      %48 = vector.broadcast %30 : f32 to vector<8x128xf32>
      %49 = vector.broadcast %cst_23 : f32 to vector<8x128xf32>
      %50 = arith.select %47, %48, %49 : vector<8x128xi1>, vector<8x128xf32>
      %c1_i32 = arith.constant 1 : i32
      %51 = vector.broadcast %c1_i32 : i32 to vector<8x128xi32>
      %52 = arith.cmpi eq, %45, %51 : vector<8x128xi32>
      %cst_24 = arith.constant 0.000000e+00 : f32
      %53 = vector.broadcast %34 : f32 to vector<8x128xf32>
      %54 = vector.broadcast %cst_24 : f32 to vector<8x128xf32>
      %55 = arith.select %52, %53, %54 : vector<8x128xi1>, vector<8x128xf32>
      %56 = arith.addf %50, %55 : vector<8x128xf32>
      %c2_i32 = arith.constant 2 : i32
      %57 = vector.broadcast %c2_i32 : i32 to vector<8x128xi32>
      %58 = arith.cmpi eq, %45, %57 : vector<8x128xi32>
      %cst_25 = arith.constant 0.000000e+00 : f32
      %59 = vector.broadcast %38 : f32 to vector<8x128xf32>
      %60 = vector.broadcast %cst_25 : f32 to vector<8x128xf32>
      %61 = arith.select %58, %59, %60 : vector<8x128xi1>, vector<8x128xf32>
      %62 = arith.addf %56, %61 : vector<8x128xf32>
      %c3_i32 = arith.constant 3 : i32
      %63 = vector.broadcast %c3_i32 : i32 to vector<8x128xi32>
      %64 = arith.cmpi eq, %45, %63 : vector<8x128xi32>
      %cst_26 = arith.constant 0.000000e+00 : f32
      %65 = vector.broadcast %43 : f32 to vector<8x128xf32>
      %66 = vector.broadcast %cst_26 : f32 to vector<8x128xf32>
      %67 = arith.select %64, %65, %66 : vector<8x128xi1>, vector<8x128xf32>
      %68 = arith.addf %62, %67 : vector<8x128xf32>
      %69 = vector.broadcast %44 : f32 to vector<8x128xf32>
      %70 = arith.mulf %69, %68 : vector<8x128xf32>
      %71 = vector.shape_cast %70 : vector<8x128xf32> to vector<1x8x128xf32>
      %c0_27 = arith.constant 0 : index
      %c0_28 = arith.constant 0 : index
      %c0_29 = arith.constant 0 : index
      %72 = vector.load %arg8[%c0_27, %c0_28, %c0_29] : memref<1x8x128xf32, #tpu.memory_space<vmem>>, vector<1x8x128xf32>
      tpu.vector_store %arg8[%c0_27, %c0_28, %c0_29], %71 {strides = array<i32>} : memref<1x8x128xf32, #tpu.memory_space<vmem>>, vector<1x8x128xf32>,
      %73 = arith.extui %16 : i1 to i32
      %c0_i32_30 = arith.constant 0 : i32
      %74 = arith.cmpi ne, %73, %c0_i32_30 : i32
      scf.if %74 {
        %75 = tpu.iota {dimensions = array<i32: 0>} : vector<128x128xi32>
        %76 = tpu.iota {dimensions = array<i32: 1>} : vector<128x128xi32>
        %77 = arith.cmpi eq, %75, %76 : vector<128x128xi32>
        %cst_31 = arith.constant 0.000000e+00 : f32
        %78 = vector.broadcast %cst_31 : f32 to vector<128x128xf32>
        %79 = arith.select %77, %17, %78 : vector<128x128xi1>, vector<128x128xf32>
        %80 = vector.shape_cast %79 : vector<128x128xf32> to vector<1x128x128xf32>
        %cst_32 = arith.constant dense<0.000000e+00> : vector<1xf32>
        %81 = vector.multi_reduction <add>, %80, %cst_32 [1, 2] : vector<1x128x128xf32> to vector<1xf32>
        %82 = vector.shape_cast %81 : vector<1xf32> to vector<1x1x1xf32>
        %83 = vector.extract %82[0, 0, 0] : f32 from vector<1x1x1xf32>
        %c0_33 = arith.constant 0 : index
        %c0_34 = arith.constant 0 : index
        %c0_35 = arith.constant 0 : index
        %84 = vector.load %arg8[%c0_33, %c0_34, %c0_35] : memref<1x8x128xf32, #tpu.memory_space<vmem>>, vector<1x8x128xf32>
        %c4_i32 = arith.constant 4 : i32
        %85 = vector.broadcast %c4_i32 : i32 to vector<8x128xi32>
        %86 = arith.cmpi eq, %45, %85 : vector<8x128xi32>
        %cst_36 = arith.constant 0.000000e+00 : f32
        %87 = vector.broadcast %83 : f32 to vector<8x128xf32>
        %88 = vector.broadcast %cst_36 : f32 to vector<8x128xf32>
        %89 = arith.select %86, %87, %88 : vector<8x128xi1>, vector<8x128xf32>
        %90 = vector.shape_cast %89 : vector<8x128xf32> to vector<1x8x128xf32>
        %91 = arith.addf %84, %90 : vector<1x8x128xf32>
        %c0_37 = arith.constant 0 : index
        %c0_38 = arith.constant 0 : index
        %c0_39 = arith.constant 0 : index
        %92 = vector.load %arg8[%c0_37, %c0_38, %c0_39] : memref<1x8x128xf32, #tpu.memory_space<vmem>>, vector<1x8x128xf32>
        tpu.vector_store %arg8[%c0_37, %c0_38, %c0_39], %91 {strides = array<i32>} : memref<1x8x128xf32, #tpu.memory_space<vmem>>, vector<1x8x128xf32>,
      } else {
      }
    } else {
    }
    return
  }
  func.func @transform_0(%arg0: i32, %arg1: i32, %arg2: memref<1xi32, #tpu.memory_space<smem>>, %arg3: memref<1xi32, #tpu.memory_space<smem>>) -> (i32, i32) {
    %0 = arith.index_cast %arg0 : i32 to index
    %1 = memref.load %arg2[%0] : memref<1xi32, #tpu.memory_space<smem>>
    %c0_i32 = arith.constant 0 : i32
    return %1, %arg1 : i32, i32
  }
  func.func @transform_1(%arg0: i32, %arg1: i32, %arg2: memref<1xi32, #tpu.memory_space<smem>>, %arg3: memref<1xi32, #tpu.memory_space<smem>>) -> (i32, i32) {
    %0 = arith.index_cast %arg0 : i32 to index
    %1 = memref.load %arg3[%0] : memref<1xi32, #tpu.memory_space<smem>>
    %c0_i32 = arith.constant 0 : i32
    return %1, %arg1 : i32, i32
  }
  func.func @transform_2(%arg0: i32, %arg1: i32, %arg2: memref<1xi32, #tpu.memory_space<smem>>, %arg3: memref<1xi32, #tpu.memory_space<smem>>) -> (i32, i32) {
    %0 = arith.index_cast %arg0 : i32 to index
    %1 = memref.load %arg2[%0] : memref<1xi32, #tpu.memory_space<smem>>
    %c0_i32 = arith.constant 0 : i32
    %c0_i32_0 = arith.constant 0 : i32
    return %1, %c0_i32 : i32, i32
  }
  func.func @transform_3(%arg0: i32, %arg1: i32, %arg2: memref<1xi32, #tpu.memory_space<smem>>, %arg3: memref<1xi32, #tpu.memory_space<smem>>) -> (i32, i32) {
    %0 = arith.index_cast %arg0 : i32 to index
    %1 = memref.load %arg3[%0] : memref<1xi32, #tpu.memory_space<smem>>
    %c0_i32 = arith.constant 0 : i32
    %c0_i32_0 = arith.constant 0 : i32
    return %c0_i32, %1 : i32, i32
  }
  func.func @transform_4(%arg0: i32, %arg1: i32, %arg2: memref<1xi32, #tpu.memory_space<smem>>, %arg3: memref<1xi32, #tpu.memory_space<smem>>) -> (i32, i32, i32) {
    %c0_i32 = arith.constant 0 : i32
    %c0_i32_0 = arith.constant 0 : i32
    %c0_i32_1 = arith.constant 0 : i32
    return %arg0, %c0_i32, %c0_i32_0 : i32, i32, i32
  }
}

</mosaic_0001>

<bundles_post_ra>
// kernel: orthogonal_projection_loss.1
= control target key start
LH: loop header
LB: loop body
LE: loop exit
PB: predicated region body
PF: predicated region fallthrough
CT: control target
= control target key end

     0   :  { %v931_v0 = vmov 0   ;;  %v932_v60 = vmov 0.0   ;;  %s1268_s1 = inlined_call_operand.<no memory space> [shape: s32[1], index: 1, kind: input, shape index: {}, may-alias: {0,1}]   ;;  %s1269_s0 = inlined_call_operand.<no memory space> [shape: s32[1], index: 0, kind: input, shape index: {}, may-alias: {0,1}]   ;;  %s1270_s3 = inlined_call_operand.vmem [shape: f32[128,128], index: 3, kind: input, shape index: {}, may-alias: {2,3}]   ;;  %s1271_s2 = inlined_call_operand.vmem [shape: f32[128,128], index: 2, kind: input, shape index: {}, may-alias: {2,3}]   ;;  %s1272_s4 = inlined_call_operand.vmem [shape: s32[128,1], index: 4, kind: input, shape index: {}]   ;;  %s1273_s5 = inlined_call_operand.vmem [shape: s32[1,128], index: 5, kind: input, shape index: {}]   ;;  %s1274_s6 = inlined_call_operand.vmem [shape: f32[1,8,128], index: 6, kind: output, shape index: {}]  }
   0x1   :  { %s759_s23 = sshll.u32 %s1268_s1, 4  ;;  %s757_s26 = sshll.u32 %s1269_s0, 4  ;;  %929 = vset.pattern.permute.xlu0 %v931_v0  ;;  %930 = vset.pattern.permute.xlu1 %v931_v0 }
   0x2   :  { %p82_p0 = scmp.lt.s32.totalorder %s759_s23, 15  ;;  %p74_p1 = scmp.lt.s32.totalorder %s757_s26, 15 }
   0x3   :  { %p97_p2 = scmp.lt.s32.totalorder %s1268_s1, 0  ;;  %p351_p3 = scmp.eq.s32.totalorder %s1269_s0, %s1268_s1 }
   0x4   :  { %s1276_s23 = smov (!%p82_p0, %s759_s23), 15  ;;  %s1278_s26 = smov (!%p74_p1, %s757_s26), 15 }
   0x5   :  { %s760_s27 = sshll.u32 %s1276_s23, 3  ;;  %s758_s7 = sshll.u32 %s1278_s26, 3 }
   0x6   :  { %s977_s30 = scalar_lea.vmem %s1270_s3, %s760_s27  ;;  %s986_s10 = scalar_lea.vmem %s1271_s2, %s758_s7 }
   0x7   :  { %v153_v1 = vld [vmem:[%s977_s30] sm:$0xff]  ;;  %v154_v2 = vld [vmem:[%s977_s30 + $0x8] sm:$0xff]  ;;  %v155_v3 = vld [vmem:[%s977_s30 + $0x10] sm:$0xff]  ;;  %s995_s2 = scalar_lea.vmem %s1272_s4, %s758_s7  ;;  %p780_p4 = scmp.ne.s32.totalorder %s1269_s0, %s1268_s1 }
   0x8   :  { %v869_v4 = vpack.c.bf16 %v154_v2, %v153_v1  ;;  %v156_v5 = vld [vmem:[%s977_s30 + $0x18] sm:$0xff]  ;;  %v137_v7 = vld [vmem:[%s986_s10] sm:$0xff]  ;;  %v158_v10 = vld [vmem:[%s977_s30 + $0x28] sm:$0xff]  ;;  %s98_s15 = scalar_select %p97_p2, %s1268_s1, 0 }
   0x9   :  { %v873_v6 = vpack.c.bf16 %v156_v5, %v155_v3  ;;  %v145_v8 = vld [vmem:[%s986_s10 + $0x40] sm:$0xff]  ;;  %845 = vmatprep.mubr.f32.mxu0 %v137_v7  ;;  %v386_v13 = vld [vmem:[%s995_s2 + $0x10] sm:$0xff]  ;;  %v385_v14 = vld [vmem:[%s995_s2 + $0x8] sm:$0xff]  ;;  %s629_s25 = scalar_select %p351_p3, 1.0, 2.0 }
   0xa   :  { %870 = vmatprep.subr.bf16.mxu0 %v869_v4  ;;  %901 = vmatprep.subr.bf16.mxu1 %v869_v4  ;;  %v157_v9 = vld [vmem:[%s977_s30 + $0x20] sm:$0xff]  ;;  %v159_v15 = vld [vmem:[%s977_s30 + $0x30] sm:$0xff]  ;;  %v160_v16 = vld [vmem:[%s977_s30 + $0x38] sm:$0xff]  ;;  %s99_s18 = scalar_lea.vmem %s1273_s5, %s98_s15 }
   0xb   :  { %872 = vmatpush3.bf16.xpose.msra.mxu0 %v869_v4  ;;  %909 = vmatpush3.bf16.xpose.msra.mxu1 %v869_v4  ;;  %v877_v11 = vpack.c.bf16 %v158_v10, %v157_v9  ;;  %v384_v12 = vld [vmem:[%s995_s2] sm:$0xff]  ;;  %v387_v17 = vld [vmem:[%s995_s2 + $0x18] sm:$0xff]  ;;  %v881_v19 = vpack.c.bf16 %v160_v16, %v159_v15  ;;  %v389_v20 = vld [vmem:[%s995_s2 + $0x28] sm:$0xff] }
   0xc   :  { %874 = vmatprep.subr.bf16.mxu0 %v873_v6  ;;  %902 = vmatprep.subr.bf16.mxu1 %v873_v6  ;;  %v388_v18 = vld [vmem:[%s995_s2 + $0x20] sm:$0xff]  ;;  %v390_v21 = vld [vmem:[%s995_s2 + $0x30] sm:$0xff]  ;;  %v162_v23 = vld [vmem:[%s977_s30 + $0x48] sm:$0xff] }
   0xd   :  { %857 = vmatprep.mubr.f32.mxu1 %v145_v8  ;;  %402 = vperm.xlu0 %929, %v384_v12   ;;  %v161_v22 = vld [vmem:[%s977_s30 + $0x40] sm:$0xff]  ;;  %v391_v24 = vld [vmem:[%s995_s2 + $0x38] sm:$0xff]  ;;  %v393_v27 = vld [vmem:[%s995_s2 + $0x48] sm:$0xff] }
   0xe   :  { %408 = vperm.xlu1 %930, %v386_v13   ;;  %v392_v25 = vld [vmem:[%s995_s2 + $0x40] sm:$0xff]  ;;  %v885_v26 = vpack.c.bf16 %v162_v23, %v161_v22  ;;  %v394_v28 = vld [vmem:[%s995_s2 + $0x50] sm:$0xff]  ;;  %v164_v30 = vld [vmem:[%s977_s30 + $0x58] sm:$0xff] }
   0xf   :  { %v163_v29 = vld [vmem:[%s977_s30 + $0x50] sm:$0xff]  ;;  %v395_v31 = vld [vmem:[%s995_s2 + $0x58] sm:$0xff]  ;;  %v396_v32 = vld [vmem:[%s995_s2 + $0x60] sm:$0xff] }
  0x10   :  { %v889_v33 = vpack.c.bf16 %v164_v30, %v163_v29  ;;  %v397_v34 = vld [vmem:[%s995_s2 + $0x68] sm:$0xff]  ;;  %v398_v35 = vld [vmem:[%s995_s2 + $0x70] sm:$0xff]  ;;  %v165_v36 = vld [vmem:[%s977_s30 + $0x60] sm:$0xff] }
  0x11   :  { %405 = vperm.xlu0 %929, %v385_v14   ;;  %v166_v37 = vld [vmem:[%s977_s30 + $0x68] sm:$0xff]  ;;  %v399_v38 = vld [vmem:[%s995_s2 + $0x78] sm:$0xff]  ;;  %v167_v40 = vld [vmem:[%s977_s30 + $0x70] sm:$0xff] }
  0x12   :  { %411 = vperm.xlu1 %930, %v387_v17   ;;  %v893_v39 = vpack.c.bf16 %v166_v37, %v165_v36  ;;  %v168_v41 = vld [vmem:[%s977_s30 + $0x78] sm:$0xff]  ;;  %v138_v43 = vld [vmem:[%s986_s10 + $0x8] sm:$0xff]  ;;  %v139_v45 = vld [vmem:[%s986_s10 + $0x10] sm:$0xff] }
  0x13   :  { %876 = vmatpush3.bf16.xpose.msra.mxu0 %v873_v6  ;;  %910 = vmatpush3.bf16.xpose.msra.mxu1 %v873_v6  ;;  %v897_v42 = vpack.c.bf16 %v168_v41, %v167_v40  ;;  %v146_v44 = vld [vmem:[%s986_s10 + $0x48] sm:$0xff]  ;;  %v147_v46 = vld [vmem:[%s986_s10 + $0x50] sm:$0xff]  ;;  %v140_v47 = vld [vmem:[%s986_s10 + $0x18] sm:$0xff] }
  0x14   :  { %878 = vmatprep.subr.bf16.mxu0 %v877_v11  ;;  %903 = vmatprep.subr.bf16.mxu1 %v877_v11  ;;  %v148_v48 = vld [vmem:[%s986_s10 + $0x58] sm:$0xff]  ;;  %v141_v49 = vld [vmem:[%s986_s10 + $0x20] sm:$0xff]  ;;  %v142_v51 = vld [vmem:[%s986_s10 + $0x28] sm:$0xff] }
  0x15   :  { %414 = vperm.xlu0 %929, %v388_v18   ;;  %v149_v50 = vld [vmem:[%s986_s10 + $0x60] sm:$0xff]  ;;  %v150_v52 = vld [vmem:[%s986_s10 + $0x68] sm:$0xff]  ;;  %v143_v53 = vld [vmem:[%s986_s10 + $0x30] sm:$0xff] }
  0x16   :  { %417 = vperm.xlu1 %930, %v389_v20   ;;  %v151_v54 = vld [vmem:[%s986_s10 + $0x70] sm:$0xff]  ;;  %v144_v55 = vld [vmem:[%s986_s10 + $0x38] sm:$0xff]  ;;  %v1046_v57 = vld [vmem:[%s99_s18] ss:$0 sm:$0xff] }
  0x17   :  { %v152_v56 = vld [vmem:[%s986_s10 + $0x78] sm:$0xff] }
  0x19   :  { %420 = vperm.xlu0 %929, %v390_v21  }
  0x1a   :  { %423 = vperm.xlu1 %930, %v391_v24  }
  0x1b   :  { %880 = vmatpush3.bf16.xpose.msra.mxu0 %v877_v11  ;;  %911 = vmatpush3.bf16.xpose.msra.mxu1 %v877_v11 }
  0x1c   :  { %882 = vmatprep.subr.bf16.mxu0 %v881_v19  ;;  %904 = vmatprep.subr.bf16.mxu1 %v881_v19 }
  0x1d   :  { %426 = vperm.xlu0 %929, %v392_v25  }
  0x1e   :  { %429 = vperm.xlu1 %930, %v393_v27  }
  0x21   :  { %432 = vperm.xlu0 %929, %v394_v28  }
  0x22   :  { %435 = vperm.xlu1 %930, %v395_v31  }
  0x23   :  { %884 = vmatpush3.bf16.xpose.msra.mxu0 %v881_v19  ;;  %912 = vmatpush3.bf16.xpose.msra.mxu1 %v881_v19 }
  0x24   :  { %886 = vmatprep.subr.bf16.mxu0 %v885_v26  ;;  %905 = vmatprep.subr.bf16.mxu1 %v885_v26 }
  0x25   :  { %438 = vperm.xlu0 %929, %v396_v32  }
  0x26   :  { %441 = vperm.xlu1 %930, %v397_v34  }
  0x29   :  { %444 = vperm.xlu0 %929, %v398_v35  }
  0x2a   :  { %447 = vperm.xlu1 %930, %v399_v38  }
  0x2b   :  { %888 = vmatpush3.bf16.xpose.msra.mxu0 %v885_v26  ;;  %913 = vmatpush3.bf16.xpose.msra.mxu1 %v885_v26 }
  0x2c   :  { %890 = vmatprep.subr.bf16.mxu0 %v889_v33  ;;  %906 = vmatprep.subr.bf16.mxu1 %v889_v33 }
  0x33   :  { %892 = vmatpush3.bf16.xpose.msra.mxu0 %v889_v33  ;;  %914 = vmatpush3.bf16.xpose.msra.mxu1 %v889_v33 }
  0x34   :  { %894 = vmatprep.subr.bf16.mxu0 %v893_v39  ;;  %907 = vmatprep.subr.bf16.mxu1 %v893_v39 }
  0x3b   :  { %896 = vmatpush3.bf16.xpose.msra.mxu0 %v893_v39  ;;  %915 = vmatpush3.bf16.xpose.msra.mxu1 %v893_v39 }
  0x3c   :  { %898 = vmatprep.subr.bf16.mxu0 %v897_v42  ;;  %908 = vmatprep.subr.bf16.mxu1 %v897_v42 }
  0x43   :  { %900 = vmatpush3.bf16.xpose.msra.mxu0 %v897_v42  ;;  %916 = vmatpush3.bf16.xpose.msra.mxu1 %v897_v42 }
  0x4a   :  { %846 = vmatmul.mubr.f32.vlgmr.msra.gmra.mrb[0].mxu0 %v138_v43  ;;  %858 = vmatmul.mubr.f32.vlgmr.msra.gmra.mrb[0].mxu1 %v146_v44 }
  0x4b   :  { %848 = vmatprep.mubr.f32.mxu0 %v139_v45  ;;  %860 = vmatprep.mubr.f32.mxu1 %v147_v46 }
  0x4e   :  { %849 = vmatmul.mubr.f32.gmra.mrb[2].mxu0 %v140_v47  ;;  %861 = vmatmul.mubr.f32.gmra.mrb[2].mxu1 %v148_v48 }
  0x4f   :  { %851 = vmatprep.mubr.f32.mxu0 %v141_v49  ;;  %863 = vmatprep.mubr.f32.mxu1 %v149_v50 }
  0x52   :  { %852 = vmatmul.mubr.f32.gmra.mrb[4].mxu0 %v142_v51  ;;  %864 = vmatmul.mubr.f32.gmra.mrb[4].mxu1 %v150_v52 }
  0x53   :  { %854 = vmatprep.mubr.f32.mxu0 %v143_v53  ;;  %866 = vmatprep.mubr.f32.mxu1 %v151_v54 }
  0x56   :  { %855 = vmatmul.mubr.f32.gmra.mrb[6].mxu0 %v144_v55  ;;  %867 = vmatmul.mubr.f32.gmra.mrb[6].mxu1 %v152_v56 }
  0x8c   :  { %v403_v58 = vpop.permute.xlu0 %402 }
  0x8d   :  { %vm453_vm0 = vcmp.eq.s32.totalorder %v403_v58, %v1046_v57  ;;  %v409_v59 = vpop.permute.xlu1 %408 }
  0x8e   :  { %v1049_v61 = vsel %vm453_vm0, 1.0, %v932_v60  ;;  %vm455_vm1 = vcmp.eq.s32.totalorder %v409_v59, %v1046_v57 }
  0x8f   :  { %v1053_v63 = vsel %vm455_vm1, 1.0, %v932_v60 }
  0x90   :  { %v406_v62 = vpop.permute.xlu0 %405 }
  0x91   :  { %vm454_vm2 = vcmp.eq.s32.totalorder %v406_v62, %v1046_v57  ;;  %v412_v2 = vpop.permute.xlu1 %411 }
  0x92   :  { %v1055_v0 = vsel %vm454_vm2, 1.0, %v932_v60  ;;  %vm456_vm3 = vcmp.eq.s32.totalorder %v412_v2, %v1046_v57 }
  0x93   :  { %v541_v1 = vadd.f32 %v1055_v0, %v1049_v61  ;;  %v1060_v4 = vsel %vm456_vm3, 1.0, %v932_v60 }
  0x94   :  { %v415_v3 = vpop.permute.xlu0 %414 }
  0x95   :  { %v542_v5 = vadd.f32 %v1053_v63, %v541_v1  ;;  %vm457_vm4 = vcmp.eq.s32.totalorder %v415_v3, %v1046_v57  ;;  %v418_v8 = vpop.permute.xlu1 %417 }
  0x96   :  { %v1064_v6 = vsel %vm457_vm4, 1.0, %v932_v60  ;;  %vm458_vm5 = vcmp.eq.s32.totalorder %v418_v8, %v1046_v57 }
  0x97   :  { %v543_v7 = vadd.f32 %v1060_v4, %v542_v5  ;;  %v1069_v11 = vsel %vm458_vm5, 1.0, %v932_v60 }
  0x98   :  { %v421_v9 = vpop.permute.xlu0 %420 }
  0x99   :  { %v544_v10 = vadd.f32 %v1064_v6, %v543_v7  ;;  %vm459_vm6 = vcmp.eq.s32.totalorder %v421_v9, %v1046_v57  ;;  %v424_v14 = vpop.permute.xlu1 %423 }
  0x9a   :  { %v1072_v12 = vsel %vm459_vm6, 1.0, %v932_v60  ;;  %vm460_vm7 = vcmp.eq.s32.totalorder %v424_v14, %v1046_v57 }
  0x9b   :  { %v545_v13 = vadd.f32 %v1069_v11, %v544_v10  ;;  %v1077_v17 = vsel %vm460_vm7, 1.0, %v932_v60 }
  0x9c   :  { %v427_v15 = vpop.permute.xlu0 %426 }
  0x9d   :  { %v546_v16 = vadd.f32 %v1072_v12, %v545_v13  ;;  %vm461_vm8 = vcmp.eq.s32.totalorder %v427_v15, %v1046_v57  ;;  %v430_v20 = vpop.permute.xlu1 %429 }
  0x9e   :  { %v1080_v18 = vsel %vm461_vm8, 1.0, %v932_v60  ;;  %vm462_vm9 = vcmp.eq.s32.totalorder %v430_v20, %v1046_v57 }
  0x9f   :  { %v547_v19 = vadd.f32 %v1077_v17, %v546_v16  ;;  %v1085_v23 = vsel %vm462_vm9, 1.0, %v932_v60 }
  0xa0   :  { %v433_v21 = vpop.permute.xlu0 %432 }
  0xa1   :  { %v548_v22 = vadd.f32 %v1080_v18, %v547_v19  ;;  %vm463_vm10 = vcmp.eq.s32.totalorder %v433_v21, %v1046_v57  ;;  %v436_v26 = vpop.permute.xlu1 %435 }
  0xa2   :  { %v1088_v24 = vsel %vm463_vm10, 1.0, %v932_v60  ;;  %vm464_vm11 = vcmp.eq.s32.totalorder %v436_v26, %v1046_v57 }
  0xa3   :  { %v549_v25 = vadd.f32 %v1085_v23, %v548_v22  ;;  %v1093_v29 = vsel %vm464_vm11, 1.0, %v932_v60 }
  0xa4   :  { %v439_v27 = vpop.permute.xlu0 %438 }
  0xa5   :  { %v550_v28 = vadd.f32 %v1088_v24, %v549_v25  ;;  %vm465_vm12 = vcmp.eq.s32.totalorder %v439_v27, %v1046_v57  ;;  %v442_v32 = vpop.permute.xlu1 %441 }
  0xa6   :  { %v1096_v30 = vsel %vm465_vm12, 1.0, %v932_v60  ;;  %vm466_vm13 = vcmp.eq.s32.totalorder %v442_v32, %v1046_v57 }
  0xa7   :  { %v551_v31 = vadd.f32 %v1093_v29, %v550_v28  ;;  %v1101_v35 = vsel %vm466_vm13, 1.0, %v932_v60 }
  0xa8   :  { %v445_v33 = vpop.permute.xlu0 %444 }
  0xa9   :  { %v552_v34 = vadd.f32 %v1096_v30, %v551_v31  ;;  %vm467_vm14 = vcmp.eq.s32.totalorder %v445_v33, %v1046_v57  ;;  %v448_v38 = vpop.permute.xlu1 %447 }
  0xaa   :  { %v1104_v36 = vsel %vm467_vm14, 1.0, %v932_v60  ;;  %vm468_vm15 = vcmp.eq.s32.totalorder %v448_v38, %v1046_v57 }
  0xab   :  { %v553_v37 = vadd.f32 %v1101_v35, %v552_v34  ;;  %v1108_v39 = vsel %vm468_vm15, 1.0, %v932_v60 }
  0xad   :  { %v554_v40 = vadd.f32 %v1104_v36, %v553_v37 }
  0xaf   :  { %v555_v41 = vadd.f32 %v1108_v39, %v554_v40 }
  0xb1   :  { %556 = vadd.xlane.f32.xlu1 %v555_v41 }
 0x11d   :  { %v1112_v42 = vpop.f32.mrb[0].mxu0  ;;  %v1114_v43 = vpop.f32.mrb[0].mxu1 }
 0x11e   :  { %v369_v44 = vand.u32 2147483647, %v1112_v42  ;;  %v502_v45 = vmul.f32 %v1112_v42, %v1055_v0  ;;  %v1119_v46 = vpop.f32.mrb[1].mxu0  ;;  %v1121_v47 = vpop.f32.mrb[1].mxu1 }
 0x11f   :  { %v368_v48 = vand.u32 2147483647, %v1119_v46  ;;  %v501_v49 = vmul.f32 %v1049_v61, %v1119_v46  ;;  %v376_v40 = vand.u32 2147483647, %v1121_v47 }
 0x120   :  { %v590_v50 = vmul.f32 %v1055_v0, %v369_v44 }
 0x121   :  { %v517_v51 = vadd.f32 %v502_v45, %v501_v49  ;;  %v565_v52 = vadd.f32 %v369_v44, %v368_v48  ;;  %v589_v53 = vmul.f32 %v1049_v61, %v368_v48  ;;  %v1128_v54 = vpop.f32.mrb[2].mxu0  ;;  %v1130_v55 = vpop.f32.mrb[2].mxu1  ;;  %v377_v49 = vand.u32 2147483647, %v1114_v43 }
 0x122   :  { %v371_v56 = vand.u32 2147483647, %v1128_v54  ;;  %v1133_v57 = vpop.f32.mrb[3].mxu0  ;;  %v1135_v58 = vpop.f32.mrb[3].mxu1  ;;  %v504_v0 = vmul.f32 %v1128_v54, %v1060_v4 }
 0x123   :  { %v605_v59 = vadd.f32 %v590_v50, %v589_v53  ;;  %v370_v60 = vand.u32 2147483647, %v1133_v57  ;;  %v503_v62 = vmul.f32 %v1053_v63, %v1133_v57 }
 0x124   :  { %v592_v7 = vmul.f32 %v1060_v4, %v371_v56 }
 0x125   :  { %v518_v61 = vadd.f32 %v517_v51, %v503_v62  ;;  %v566_v1 = vadd.f32 %v565_v52, %v370_v60  ;;  %v591_v2 = vmul.f32 %v1053_v63, %v370_v60  ;;  %v1143_v3 = vpop.f32.mrb[4].mxu0  ;;  %v1145_v5 = vpop.f32.mrb[4].mxu1  ;;  %v509_v52 = vmul.f32 %v1080_v18, %v1121_v47 }
 0x126   :  { %v373_v8 = vand.u32 2147483647, %v1143_v3  ;;  %v1149_v9 = vpop.f32.mrb[5].mxu0  ;;  %v1151_v10 = vpop.f32.mrb[5].mxu1  ;;  %v506_v25 = vmul.f32 %v1143_v3, %v1069_v11  ;;  %v510_v62 = vmul.f32 %v1114_v43, %v1085_v23 }
 0x127   :  { %v606_v13 = vadd.f32 %v605_v59, %v591_v2  ;;  %v372_v14 = vand.u32 2147483647, %v1149_v9  ;;  %v505_v15 = vmul.f32 %v1064_v6, %v1149_v9  ;;  %v519_v16 = vadd.f32 %v518_v61, %v504_v0 }
 0x128   :  { %v567_v63 = vadd.f32 %v566_v1, %v371_v56  ;;  %v594_v31 = vmul.f32 %v1069_v11, %v373_v8  ;;  %v597_v59 = vmul.f32 %v1080_v18, %v376_v40  ;;  %v598_v1 = vmul.f32 %v1085_v23, %v377_v49 }
 0x129   :  { %v520_v19 = vadd.f32 %v519_v16, %v505_v15  ;;  %v593_v20 = vmul.f32 %v1064_v6, %v372_v14  ;;  %v607_v21 = vadd.f32 %v606_v13, %v592_v7  ;;  %v1157_v22 = vpop.f32.mrb[6].mxu0  ;;  %v1159_v4 = vpop.f32.mrb[6].mxu1  ;;  %v511_v7 = vmul.f32 %v1088_v24, %v1135_v58 }
 0x12a   :  { %v568_v26 = vadd.f32 %v567_v63, %v372_v14  ;;  %v1163_v27 = vpop.f32.mrb[7].mxu0  ;;  %v1165_v28 = vpop.f32.mrb[7].mxu1  ;;  %v375_v33 = vand.u32 2147483647, %v1157_v22  ;;  %v508_v45 = vmul.f32 %v1157_v22, %v1077_v17  ;;  %v380_v14 = vand.u32 2147483647, %v1151_v10 }
 0x12b   :  { %v608_v32 = vadd.f32 %v607_v21, %v593_v20  ;;  %v374_v6 = vand.u32 2147483647, %v1163_v27  ;;  %v507_v34 = vmul.f32 %v1072_v12, %v1163_v27  ;;  %v521_v37 = vadd.f32 %v520_v19, %v506_v25 }
 0x12c   :  { %v569_v38 = vadd.f32 %v568_v26, %v373_v8  ;;  %v596_v50 = vmul.f32 %v1077_v17, %v375_v33  ;;  %v379_v17 = vand.u32 2147483647, %v1130_v55  ;;  %v512_v16 = vmul.f32 %v1130_v55, %v1093_v29 }
 0x12d   :  { %v595_v41 = vmul.f32 %v1072_v12, %v374_v6  ;;  %v609_v44 = vadd.f32 %v608_v32, %v594_v31  ;;  %v522_v48 = vadd.f32 %v521_v37, %v507_v34  ;;  %v378_v12 = vand.u32 2147483647, %v1135_v58 }
 0x12e   :  { %v570_v11 = vadd.f32 %v569_v38, %v374_v6  ;;  %v600_v23 = vmul.f32 %v1093_v29, %v379_v17  ;;  %v381_v20 = vand.u32 2147483647, %v1145_v5  ;;  %v513_v25 = vmul.f32 %v1096_v30, %v1151_v10 }
 0x12f   :  { %v610_v51 = vadd.f32 %v609_v44, %v595_v41  ;;  %v523_v53 = vadd.f32 %v522_v48, %v508_v45  ;;  %v599_v18 = vmul.f32 %v1088_v24, %v378_v12  ;;  %v601_v24 = vmul.f32 %v1096_v30, %v380_v14 }
 0x130   :  { %v571_v56 = vadd.f32 %v570_v11, %v375_v33  ;;  %v382_v32 = vand.u32 2147483647, %v1165_v28  ;;  %v514_v6 = vmul.f32 %v1145_v5, %v1101_v35  ;;  %v602_v29 = vmul.f32 %v1101_v35, %v381_v20 }
 0x131   :  { %v611_v60 = vadd.f32 %v610_v51, %v596_v50  ;;  %v524_v0 = vadd.f32 %v523_v53, %v509_v52  ;;  %v383_v38 = vand.u32 2147483647, %v1159_v4  ;;  %v515_v41 = vmul.f32 %v1104_v36, %v1165_v28 }
 0x132   :  { %v572_v61 = vadd.f32 %v571_v56, %v376_v40  ;;  %v603_v30 = vmul.f32 %v1104_v36, %v382_v32  ;;  %v516_v11 = vmul.f32 %v1159_v4, %v1108_v39 }
 0x133   :  { %v612_v2 = vadd.f32 %v611_v60, %v597_v59  ;;  %v525_v8 = vadd.f32 %v524_v0, %v510_v62  ;;  %v604_v51 = vmul.f32 %v1108_v39, %v383_v38 }
 0x134   :  { %v573_v13 = vadd.f32 %v572_v61, %v377_v49 }
 0x135   :  { %v613_v15 = vadd.f32 %v612_v2, %v598_v1  ;;  %v526_v63 = vadd.f32 %v525_v8, %v511_v7 }
 0x136   :  { %v574_v19 = vadd.f32 %v573_v13, %v378_v12 }
 0x137   :  { %v614_v21 = vadd.f32 %v613_v15, %v599_v18  ;;  %v527_v26 = vadd.f32 %v526_v63, %v512_v16 }
 0x138   :  { %v575_v31 = vadd.f32 %v574_v19, %v379_v17 }
 0x139   :  { %v615_v33 = vadd.f32 %v614_v21, %v600_v23  ;;  %v528_v34 = vadd.f32 %v527_v26, %v513_v25 }
 0x13a   :  { %v576_v37 = vadd.f32 %v575_v31, %v380_v14 }
 0x13b   :  { %v616_v40 = vadd.f32 %v615_v33, %v601_v24  ;;  %v529_v44 = vadd.f32 %v528_v34, %v514_v6  ;;  %v630_v33 = vlaneseq }
 0x13c   :  { %v577_v45 = vadd.f32 %v576_v37, %v381_v20 }
 0x13d   :  { %v617_v48 = vadd.f32 %v616_v40, %v602_v29  ;;  %v530_v49 = vadd.f32 %v529_v44, %v515_v41  ;;  %v1208_v6 = vshrl.u32 %v630_v33, 7 }
 0x13e   :  { %v578_v50 = vadd.f32 %v577_v45, %v382_v32  ;;  %v557_v59 = vpop.xlane.xlu1 %556 }
 0x13f   :  { %v618_v52 = vadd.f32 %v617_v48, %v603_v30  ;;  %v531_v35 = vadd.f32 %v530_v49, %v516_v11  ;;  %v558_v12 = vrot.slane %v557_v59, 4  ;;  %vm632_vm0 = vcmp.eq.s32.totalorder %v1208_v6, 0 }
 0x140   :  { %v579_v53 = vadd.f32 %v578_v50, %v383_v38  ;;  %vm635_vm1 = vcmp.eq.s32.totalorder %v1208_v6, 1  ;;  %vm639_vm2 = vcmp.eq.s32.totalorder %v1208_v6, 2  ;;  %vm643_vm3 = vcmp.eq.s32.totalorder %v1208_v6, 3 }
 0x141   :  { %v619_v56 = vadd.f32 %v618_v52, %v604_v51  ;;  %532 = vadd.xlane.f32.xlu0 %v531_v35  ;;  %v559_v60 = vadd.f32 %v558_v12, %v557_v59  ;;  %v647_v11 = vstv %s629_s25  ;;  %v653_v51 = vadd.s32 (!%p780_p4), 8, %v1208_v6 }
 0x142   :  { %v669_v52 = vand.u32 (!%p780_p4), 127, %v630_v33  ;;  %v654_v35 = vadd.s32 (!%p780_p4), 16, %v1208_v6 }
 0x143   :  { %v560_v62 = vrot.slane %v559_v60, 2 }
 0x144   :  { %vm670_vm4 = vcmp.eq.s32.totalorder (!%p780_p4), %v1208_v6, %v669_v52  ;;  %vm671_vm5 = vcmp.eq.s32.totalorder (!%p780_p4), %v653_v51, %v669_v52  ;;  %vm672_vm6 = vcmp.eq.s32.totalorder (!%p780_p4), %v654_v35, %v669_v52 }
 0x145   :  { %580 = vadd.xlane.f32.xlu0 %v579_v53  ;;  %v561_v1 = vadd.f32 %v560_v62, %v559_v60  ;;  %v655_v53 = vadd.s32 (!%p780_p4), 24, %v1208_v6  ;;  %v686_v59 = vsel (!%p780_p4), %vm670_vm4, %v1119_v46, 0.0  ;;  %v687_v12 = vsel (!%p780_p4), %vm671_vm5, %v1112_v42, 0.0 }
 0x146   :  { %v657_v60 = vadd.s32 (!%p780_p4), 40, %v1208_v6  ;;  %v688_v62 = vsel (!%p780_p4), %vm672_vm6, %v1133_v57, 0.0  ;;  %v660_v46 = vadd.s32 (!%p780_p4), 64, %v1208_v6  ;;  %v661_v57 = vadd.s32 (!%p780_p4), 72, %v1208_v6 }
 0x147   :  { %v562_v18 = vrot.slane %v561_v1, 1  ;;  %vm673_vm7 = vcmp.eq.s32.totalorder (!%p780_p4), %v655_v53, %v669_v52  ;;  %vm727_vm4 = vcmp.eq.s32.totalorder (!%p780_p4), %v1208_v6, 4 }
 0x148   :  { %vm675_vm9 = vcmp.eq.s32.totalorder (!%p780_p4), %v657_v60, %v669_v52  ;;  %vm678_vm12 = vcmp.eq.s32.totalorder (!%p780_p4), %v660_v46, %v669_v52  ;;  %vm679_vm13 = vcmp.eq.s32.totalorder (!%p780_p4), %v661_v57, %v669_v52 }
 0x149   :  { %620 = vadd.xlane.f32.xlu0 %v619_v56  ;;  %v563_v20 = vadd.f32 %v562_v18, %v561_v1  ;;  %v656_v56 = vadd.s32 (!%p780_p4), 32, %v1208_v6  ;;  %v659_v1 = vadd.s32 (!%p780_p4), 56, %v1208_v6 }
 0x14b   :  { %vm674_vm8 = vcmp.eq.s32.totalorder (!%p780_p4), %v656_v56, %v669_v52  ;;  %vm677_vm11 = vcmp.eq.s32.totalorder (!%p780_p4), %v659_v1, %v669_v52 }
 0x14c   :  { %v693_v18 = vsel (!%p780_p4), %vm677_vm11, %v1157_v22, 0.0  ;;  %v666_v22 = vadd.s32 (!%p780_p4), 112, %v1208_v6 }
 0x1ce   :  { %v533_v36 = vpop.xlane.xlu0 %532 }
 0x1cf   :  { %v534_v0 = vrot.slane %v533_v36, 4 }
 0x1d1   :  { %v535_v61 = vadd.f32 %v534_v0, %v533_v36  ;;  %v658_v36 = vadd.s32 (!%p780_p4), 48, %v1208_v6  ;;  %v702_v0 = vadd.f32 (!%p780_p4), %v687_v12, %v686_v59 }
 0x1d2   :  { %v581_v17 = vpop.xlane.xlu0 %580 }
 0x1d3   :  { %v536_v2 = vrot.slane %v535_v61, 2  ;;  %v582_v7 = vrot.slane %v581_v17, 4  ;;  %vm676_vm10 = vcmp.eq.s32.totalorder (!%p780_p4), %v658_v36, %v669_v52 }
 0x1d5   :  { %v583_v8 = vadd.f32 %v582_v7, %v581_v17  ;;  %v537_v39 = vadd.f32 %v536_v2, %v535_v61  ;;  %v689_v61 = vsel (!%p780_p4), %vm673_vm7, %v1128_v54, 0.0  ;;  %v703_v17 = vadd.f32 (!%p780_p4), %v702_v0, %v688_v62 }
 0x1d6   :  { %v621_v13 = vpop.xlane.xlu0 %620  ;;  %v690_v2 = vsel (!%p780_p4), %vm674_vm8, %v1149_v9, 0.0  ;;  %v691_v7 = vsel (!%p780_p4), %vm675_vm9, %v1143_v3, 0.0  ;;  %v662_v54 = vadd.s32 (!%p780_p4), 80, %v1208_v6  ;;  %v663_v9 = vadd.s32 (!%p780_p4), 88, %v1208_v6 }
 0x1d7   :  { %v584_v14 = vrot.slane %v583_v8, 2  ;;  %v622_v15 = vrot.slane %v621_v13, 4  ;;  %v538_v16 = vrot.slane %v537_v39, 1  ;;  %v704_v42 = vadd.f32 (!%p780_p4), %v703_v17, %v689_v61 }
 0x1d8   :  { %v664_v3 = vadd.s32 (!%p780_p4), 96, %v1208_v6  ;;  %vm680_vm14 = vcmp.eq.s32.totalorder (!%p780_p4), %v662_v54, %v669_v52  ;;  %vm681_vm15 = vcmp.eq.s32.totalorder (!%p780_p4), %v663_v9, %v669_v52 }
 0x1d9   :  { %v623_v63 = vadd.f32 %v622_v15, %v621_v13  ;;  %v539_v19 = vadd.f32 %v538_v16, %v537_v39  ;;  %v585_v23 = vadd.f32 %v584_v14, %v583_v8  ;;  %v705_v8 = vadd.f32 (!%p780_p4), %v704_v42, %v690_v2 }
 0x1da   :  { %v692_v39 = vsel (!%p780_p4), %vm676_vm10, %v1163_v27, 0.0  ;;  %v694_v15 = vsel (!%p780_p4), %vm678_vm12, %v1121_v47, 0.0  ;;  %v665_v27 = vadd.s32 (!%p780_p4), 104, %v1208_v6  ;;  %v667_v47 = vadd.s32 (!%p780_p4), 120, %v1208_v6 }
 0x1db   :  { %v624_v21 = vrot.slane %v623_v63, 2  ;;  %917 = vpush %v539_v19  ;;  %v586_v25 = vrot.slane %v585_v23, 1  ;;  %v706_v13 = vadd.f32 (!%p780_p4), %v705_v8, %v691_v7 }
 0x1dc   :  { %919 = vpush %v563_v20 }
 0x1dd   :  { %v625_v26 = vadd.f32 %v624_v21, %v623_v63  ;;  %v587_v31 = vadd.f32 %v586_v25, %v585_v23  ;;  %v707_v14 = vadd.f32 (!%p780_p4), %v706_v13, %v692_v39  ;;  %v695_v63 = vsel (!%p780_p4), %vm679_vm13, %v1114_v43, 0.0 }
 0x1de   :  { %v696_v23 = vsel (!%p780_p4), %vm680_vm14, %v1135_v58, 0.0  ;;  %v697_v21 = vsel (!%p780_p4), %vm681_vm15, %v1130_v55, 0.0 }
 0x1df   :  { %921 = vpush %v587_v31  ;;  %v626_v24 = vrot.slane %v625_v26, 1  ;;  %v708_v16 = vadd.f32 (!%p780_p4), %v707_v14, %v693_v18 }
 0x1e1   :  { %v627_v32 = vadd.f32 %v626_v24, %v625_v26  ;;  %v709_v19 = vadd.f32 (!%p780_p4), %v708_v16, %v694_v15 }
 0x1e3   :  { %923 = vpush %v627_v32  ;;  %v710_v20 = vadd.f32 (!%p780_p4), %v709_v19, %v695_v63 }
 0x1e5   :  { %v711_v25 = vadd.f32 (!%p780_p4), %v710_v20, %v696_v23 }
 0x1e7   :  { %v712_v43 = vadd.f32 (!%p780_p4), %v711_v25, %v697_v21 }
 0x20c   :  { %s918_s5 = spop %917 }
 0x20d   :  { %v633_v34 = vstv %s918_s5  ;;  %s920_s19 = spop %919 }
 0x20e   :  { %v636_v37 = vstv %s920_s19  ;;  %v634_v29 = vsel %vm632_vm0, %v633_v34, 0.0  ;;  %vm682_vm0 = vcmp.eq.s32.totalorder (!%p780_p4), %v664_v3, %v669_v52 }
 0x20f   :  { %v637_v38 = vsel %vm635_vm1, %v636_v37, 0.0  ;;  %vm683_vm1 = vcmp.eq.s32.totalorder (!%p780_p4), %v665_v27, %v669_v52  ;;  %v698_v26 = vsel (!%p780_p4), %vm682_vm0, %v1151_v10, 0.0 }
 0x210   :  { %s922_s24 = spop %921  ;;  %v638_v44 = vadd.f32 %v637_v38, %v634_v29  ;;  %v699_v31 = vsel (!%p780_p4), %vm683_vm1, %v1145_v5, 0.0  ;;  %v713_v24 = vadd.f32 (!%p780_p4), %v712_v43, %v698_v26 }
 0x211   :  { %v640_v40 = vstv %s922_s24 }
 0x212   :  { %v641_v41 = vsel %vm639_vm2, %v640_v40, 0.0  ;;  %vm684_vm2 = vcmp.eq.s32.totalorder (!%p780_p4), %v666_v22, %v669_v52  ;;  %v714_v32 = vadd.f32 (!%p780_p4), %v713_v24, %v699_v31 }
 0x213   :  { %v642_v45 = vadd.f32 %v641_v41, %v638_v44  ;;  %v700_v58 = vsel (!%p780_p4), %vm684_vm2, %v1165_v28, 0.0 }
 0x214   :  { %s924_s26 = spop %923  ;;  %v715_v34 = vadd.f32 (!%p780_p4), %v714_v32, %v700_v58 }
 0x215   :  { %v644_v30 = vstv %s924_s26  ;;  %652 = sbr.rel (%p780_p4) target bundleno = 747 (0x2eb), region = 29 }
 0x216   :  { %v645_v48 = vsel %vm643_vm3, %v644_v30, 0.0  ;;  %vm685_vm3 = vcmp.eq.s32.totalorder (!%p780_p4), %v667_v47, %v669_v52 }
 0x217   :  { %v646_v49 = vadd.f32 %v645_v48, %v642_v45  ;;  %v701_v33 = vsel (!%p780_p4), %vm685_vm3, %v1159_v4, 0.0 }
 0x218   :  { %v716_v37 = vadd.f32 (!%p780_p4), %v715_v34, %v701_v33 }
 0x219   :  { %v648_v50 = vmul.f32 %v647_v11, %v646_v49 }
 0x21a   :  { %717 = vadd.xlane.f32.xlu0 (!%p780_p4), %v716_v37 }
 0x21b   :  { %649 = vst [vmem:[%s1274_s6] sm:$0xff] %v648_v50 }
 0x222   :  { %v726_v5 = vld [vmem:[%s1274_s6] sm:$0xff] }
 0x2a7   :  { %v718_v55 = vpop.xlane.xlu0 %717 }
 0x2a8   :  { %v719_v29 = vrot.slane %v718_v55, 4 }
 0x2aa   :  { %v720_v38 = vadd.f32 %v719_v29, %v718_v55 }
 0x2ac   :  { %v721_v40 = vrot.slane %v720_v38, 2 }
 0x2ae   :  { %v722_v41 = vadd.f32 %v721_v40, %v720_v38 }
 0x2b0   :  { %v723_v10 = vrot.slane %v722_v41, 1 }
 0x2b2   :  { %v724_v44 = vadd.f32 %v723_v10, %v722_v41 }
 0x2b4   :  { %925 = vpush %v724_v44 }
 0x2e5   :  { %s926_s0 = spop %925 }
 0x2e6   :  { %v728_v28 = vstv %s926_s0 }
 0x2e7   :  { %v729_v4 = vsel %vm727_vm4, %v728_v28, 0.0 }
 0x2e8   :  { %v730_v45 = vadd.f32 %v729_v4, %v726_v5 }
 0x2ea   :  { %731 = vst [vmem:[%s1274_s6] sm:$0xff] %v730_v45 }
 0x2eb PF:  {}

</bundles_post_ra>
